<compile_context>
chip_gen: v7x
topology: tpu7x:2x2x1
jax: 0.10.0
libtpu: 0.0.40
codegen_flags: <defaults>
</compile_context>

<pallas_src>
import functools

import jax
import jax.numpy as jnp
from jax import lax
from jax.experimental import pallas as pl
from jax.experimental.pallas import tpu as pltpu

LN_EPS = 1e-5     # torch.nn.LayerNorm default
_ROW_ALIGN = 16   # sublane-valid row tiling for both f32 (8) and bf16 (16)


def _round_up(a: int, b: int) -> int:
    return (a + b - 1) // b * b


@functools.lru_cache(maxsize=1)
def _vmem_capacity_bytes() -> int:
    """Per-core VMEM capacity; conservative 64 MiB fallback if unknown."""
    try:
        info = pltpu.get_tpu_info()
        cap = getattr(info, "vmem_capacity_bytes", None)
        if cap:
            return int(cap)
    except Exception:
        pass
    return 64 * 2 ** 20


def _layernorm_rows(x_ref, g_ref, b_ref, out_dtype):
    """One-pass LayerNorm of the current (TM, D) row tile, stats in f32."""
    x = x_ref[...].astype(jnp.float32)
    d_inv = 1.0 / x.shape[-1]
    s1 = jnp.sum(x, axis=-1, keepdims=True)
    s2 = jnp.sum(x * x, axis=-1, keepdims=True)
    mean = s1 * d_inv
    # torch LayerNorm uses biased variance; clamp guards one-pass roundoff.
    var = jnp.maximum(s2 * d_inv - mean * mean, 0.0)
    xn = (x - mean) * lax.rsqrt(var + LN_EPS)
    return (xn * g_ref[...] + b_ref[...]).astype(out_dtype)


def _prenorm_linear_resident_kernel(x_ref, g_ref, b_ref, w_ref, wb_ref, o_ref):
    """Grid = (row tiles,).  Weight (D, DO_pad) has a constant index_map ->
    DMA'd once and VMEM-resident; LayerNorm feeds the MXU directly."""
    y = _layernorm_rows(x_ref, g_ref, b_ref, w_ref.dtype)
    out = jnp.dot(y, w_ref[...], preferred_element_type=jnp.float32)
    o_ref[...] = (out + wb_ref[...]).astype(o_ref.dtype)


def _prenorm_linear_split_kernel(x_ref, g_ref, b_ref, w_ref, wb_ref, o_ref,
                                 y_ref):
    """Grid = (row tiles i [parallel], output-feature tiles j [arbitrary]).

    y_ref caches the LayerNorm'd rows at j == 0 and is reused for j > 0.
    Correctness requires j to be the innermost, sequentially executed
    ("arbitrary") axis -- it must NEVER be marked "parallel".
    """
    @pl.when(pl.program_id(1) == 0)
    def _():
        y_ref[...] = _layernorm_rows(x_ref, g_ref, b_ref, y_ref.dtype)

    # bf16 x bf16 -> f32 accumulation on the MXU.
    out = jnp.dot(y_ref[...], w_ref[...], preferred_element_type=jnp.float32)
    o_ref[...] = (out + wb_ref[...]).astype(o_ref.dtype)


@functools.partial(
    jax.jit, static_argnames=("tm", "tn", "mxu_dtype", "out_dtype", "mode"))
def prenorm_linear(x, gamma, beta, w, wb, *, tm=None, tn=256,
                   mxu_dtype=jnp.bfloat16, out_dtype=None, mode="auto"):
    """PreNorm(dim, fn=Linear(dim, dim_out)) forward.  x: (B, N, D).

    mode: "auto" | "resident" (weight stays in VMEM, 1-D grid)
                 | "split"    (2-D grid tiled over output features).
    """
    B, N, D = x.shape
    DO = w.shape[-1]
    M = B * N
    out_dtype = x.dtype if out_dtype is None else jnp.dtype(out_dtype)

    xb = jnp.dtype(x.dtype).itemsize
    ob = jnp.dtype(out_dtype).itemsize
    mxb = jnp.dtype(mxu_dtype).itemsize

    vmem_cap = _vmem_capacity_bytes()
    small_vmem = vmem_cap <= 64 * 2 ** 20          # v7x-class (64 MiB / TC)
    # Scoped-VMEM ceiling: never claim all of physical VMEM on 64 MiB parts;
    # allow well above the 32 MiB default on the 128 MiB parts (v5e / v6e).
    ceiling = (46 * 2 ** 20) if small_vmem else (100 * 2 ** 20)

    DO_pad = _round_up(DO, 128)                    # lane-dense output

    def pick_tm(tm_req):
        # Largest row tile <= tm_req that keeps row-padding waste under
        # _ROW_ALIGN rows (instead of always padding M up to a multiple of tm).
        tm_req = max(_ROW_ALIGN, min(tm_req, _round_up(M, _ROW_ALIGN)))
        n_tiles = pl.cdiv(M, tm_req)
        t = _round_up(pl.cdiv(M, n_tiles), _ROW_ALIGN)
        return min(t, _round_up(M, _ROW_ALIGN))

    def resident_est(t):                           # VMEM bytes needed
        return (2 * t * D * xb                     # x tile (double-buffered)
                + 2 * D * DO_pad * mxb             # weight (conservative 2x)
                + 2 * t * DO_pad * ob              # out tile
                + 2 * (2 * D + DO_pad) * 4         # gamma / beta / bias
                + 3 * t * D * 4 + t * DO_pad * 4)  # in-kernel f32 temporaries

    def split_est(t, n):
        return (2 * t * D * xb + t * D * mxb       # x tile + y scratch
                + 2 * D * n * mxb                  # weight tile
                + 2 * t * n * ob                   # out tile
                + 2 * (2 * D + n) * 4
                + 3 * t * D * 4 + t * n * 4)

    if mode == "resident":
        resident = True
    elif mode == "split":
        resident = False
    else:
        resident = (resident_est(pick_tm(256 if tm is None else tm))
                    <= int(0.85 * ceiling))

    if resident:
        tm_eff = pick_tm(256 if tm is None else tm)
        tn_eff = DO_pad
    else:
        # Bigger row tile halves the dominant weight re-streaming traffic.
        tm_eff = pick_tm(512 if tm is None else tm)
        tn_eff = min(_round_up(tn, 128), DO_pad)

    # v7x has 2 TensorCores and only the ("parallel") row axis shards across
    # them: guarantee at least 2 row tiles when M allows it.
    if small_vmem and M > _ROW_ALIGN and pl.cdiv(M, tm_eff) < 2:
        tm_eff = pick_tm(_round_up(pl.cdiv(M, 2), _ROW_ALIGN))

    M_pad = _round_up(M, tm_eff)
    n_row_tiles = M_pad // tm_eff

    # ---- wrapper-side layout plumbing / one-time constant casts -----------
    x2 = x.reshape(M, D)
    if M_pad != M:
        x2 = jnp.pad(x2, ((0, M_pad - M), (0, 0)))

    g = gamma.reshape(1, D).astype(jnp.float32)
    b = beta.reshape(1, D).astype(jnp.float32)
    w_p = w.astype(mxu_dtype)
    wb_p = wb.reshape(1, DO).astype(jnp.float32)
    if DO_pad != DO:
        w_p = jnp.pad(w_p, ((0, 0), (0, DO_pad - DO)))
        wb_p = jnp.pad(wb_p, ((0, 0), (0, DO_pad - DO)))

    est = resident_est(tm_eff) if resident else split_est(tm_eff, tn_eff)
    vmem_limit = int(min(ceiling, max(32 * 2 ** 20, int(1.5 * est))))

    # Weight (and small constants) are re-streamed once per row tile in the
    # split path; count that so XLA sees the true memory-bound cost.
    restream = 1 if resident else n_row_tiles
    cost = pl.CostEstimate(
        flops=2 * M_pad * D * DO_pad + 8 * M_pad * D,
        transcendentals=M_pad,                     # one rsqrt per row
        bytes_accessed=(M_pad * D * xb + M_pad * DO_pad * ob
                        + restream * (w_p.size * mxb + DO_pad * 4 + 2 * D * 4)),
    )

    if resident:
        grid_spec = pltpu.PrefetchScalarGridSpec(
            num_scalar_prefetch=0,
            grid=(n_row_tiles,),
            in_specs=[
                pl.BlockSpec((tm_eff, D), lambda i: (i, 0)),
                pl.BlockSpec((1, D), lambda i: (0, 0)),
                pl.BlockSpec((1, D), lambda i: (0, 0)),
                pl.BlockSpec((D, DO_pad), lambda i: (0, 0)),   # VMEM-resident
                pl.BlockSpec((1, DO_pad), lambda i: (0, 0)),
            ],
            out_specs=pl.BlockSpec((tm_eff, DO_pad), lambda i: (i, 0)),
        )
        kernel = _prenorm_linear_resident_kernel
        semantics = ("parallel",)
    else:
        grid_spec = pltpu.PrefetchScalarGridSpec(
            num_scalar_prefetch=0,
            grid=(n_row_tiles, DO_pad // tn_eff),
            in_specs=[
                pl.BlockSpec((tm_eff, D), lambda i, j: (i, 0)),
                pl.BlockSpec((1, D), lambda i, j: (0, 0)),
                pl.BlockSpec((1, D), lambda i, j: (0, 0)),
                # v5e-only sweep candidate: pipeline_mode=pl.Buffered(3) here.
                pl.BlockSpec((D, tn_eff), lambda i, j: (0, j)),
                pl.BlockSpec((1, tn_eff), lambda i, j: (0, j)),
            ],
            out_specs=pl.BlockSpec((tm_eff, tn_eff), lambda i, j: (i, j)),
            scratch_shapes=[pltpu.VMEM((tm_eff, D), mxu_dtype)],
        )
        kernel = _prenorm_linear_split_kernel
        # j MUST stay "arbitrary" (sequential): the LN scratch is written only
        # at j == 0 and reused for j > 0.
        semantics = ("parallel", "arbitrary")

    out2 = pl.pallas_call(
        kernel,
        out_shape=jax.ShapeDtypeStruct((M_pad, DO_pad), out_dtype),
        grid_spec=grid_spec,
        compiler_params=pltpu.CompilerParams(
            dimension_semantics=semantics,
            vmem_limit_bytes=vmem_limit,
        ),
        cost_estimate=cost,
    )(x2, g, b, w_p, wb_p)

    return out2[:M, :DO].reshape(B, N, DO)


# ---------------------------- references -----------------------------------
def _reference_f32(x, gamma, beta, w, wb):
    xf = x.astype(jnp.float32)
    mean = jnp.mean(xf, axis=-1, keepdims=True)
    var = jnp.mean((xf - mean) ** 2, axis=-1, keepdims=True)
    xn = (xf - mean) * lax.rsqrt(var + LN_EPS)
    y = xn * gamma.reshape(1, 1, -1) + beta.reshape(1, 1, -1)
    out = jnp.einsum("bnd,do->bno", y, w.astype(jnp.float32))
    return (out + wb.reshape(1, 1, -1)).astype(x.dtype)


def _reference_mxu(x, gamma, beta, w, wb, mxu_dtype=jnp.bfloat16):
    """Matches kernel numerics: one-pass f32 LN stats, bf16 matmul, f32 acc."""
    xf = x.astype(jnp.float32)
    mean = jnp.mean(xf, axis=-1, keepdims=True)
    var = jnp.maximum(jnp.mean(xf * xf, axis=-1, keepdims=True) - mean * mean,
                      0.0)
    xn = (xf - mean) * lax.rsqrt(var + LN_EPS)
    y = (xn * gamma.reshape(1, 1, -1) + beta.reshape(1, 1, -1)).astype(mxu_dtype)
    out = jnp.einsum("bnd,do->bno", y, w.astype(mxu_dtype),
                     preferred_element_type=jnp.float32)
    return (out + wb.reshape(1, 1, -1)).astype(x.dtype)


if __name__ == "__main__":
    key = jax.random.PRNGKey(0)

    # --- test 1: small ViT-ish shape (auto -> weight-resident path) --------
    B, N, D, DO = 2, 8, 32, 32
    kx, kw, kb = jax.random.split(key, 3)
    x = jax.random.normal(kx, (B, N, D), dtype=jnp.float32)
    gamma = jnp.ones((D,), dtype=jnp.float32)   # nn.LayerNorm default init
    beta = jnp.zeros((D,), dtype=jnp.float32)
    w = jax.random.normal(kw, (D, DO), dtype=jnp.float32) * 0.02
    wb = jax.random.normal(kb, (DO,), dtype=jnp.float32) * 0.02

    out = jax.block_until_ready(prenorm_linear(x, gamma, beta, w, wb))
    assert out.shape == (B, N, DO)
    ref_mxu = _reference_mxu(x, gamma, beta, w, wb)
    ref_f32 = _reference_f32(x, gamma, beta, w, wb)
    assert jnp.allclose(out, ref_mxu, atol=5e-4, rtol=5e-4), \
        "mismatch (bf16-matched ref, test1)"
    assert jnp.allclose(out, ref_f32, atol=2e-2, rtol=2e-2), \
        "mismatch (f32 ref, test1)"

    # bf16 output path (halves output HBM traffic on memory-bound shapes)
    out_bf16 = jax.block_until_ready(
        prenorm_linear(x, gamma, beta, w, wb, out_dtype=jnp.bfloat16))
    assert out_bf16.dtype == jnp.bfloat16
    assert jnp.allclose(out_bf16.astype(jnp.float32), ref_mxu,
                        atol=1e-2, rtol=1e-2), "mismatch (bf16 output, test1)"

    # --- test 2: row/feature padding, multiple row tiles, resident path ----
    B2, N2, D2, DO2 = 2, 40, 64, 160
    kx2, kw2, kb2, kg2 = jax.random.split(jax.random.PRNGKey(1), 4)
    x2 = jax.random.normal(kx2, (B2, N2, D2), dtype=jnp.float32)
    gamma2 = 1.0 + 0.1 * jax.random.normal(kg2, (D2,), dtype=jnp.float32)
    beta2 = 0.1 * jax.random.normal(kb2, (D2,), dtype=jnp.float32)
    w2 = jax.random.normal(kw2, (D2, DO2), dtype=jnp.float32) * 0.02
    wb2 = jax.random.normal(kb2, (DO2,), dtype=jnp.float32) * 0.02

    out2 = jax.block_until_ready(prenorm_linear(x2, gamma2, beta2, w2, wb2))
    assert out2.shape == (B2, N2, DO2)
    ref2_mxu = _reference_mxu(x2, gamma2, beta2, w2, wb2)
    ref2_f32 = _reference_f32(x2, gamma2, beta2, w2, wb2)
    assert jnp.allclose(out2, ref2_mxu, atol=5e-4, rtol=5e-4), \
        "mismatch (bf16-matched ref, test2)"
    assert jnp.allclose(out2, ref2_f32, atol=2e-2, rtol=2e-2), \
        "mismatch (f32 ref, test2)"

    # --- test 3: forced DO-split path (exercises y scratch + pl.when gate) -
    out3 = jax.block_until_ready(
        prenorm_linear(x2, gamma2, beta2, w2, wb2, tm=32, tn=128, mode="split"))
    assert out3.shape == (B2, N2, DO2)
    assert jnp.allclose(out3, ref2_mxu, atol=5e-4, rtol=5e-4), \
        "mismatch (bf16-matched ref, test3)"
    assert jnp.allclose(out3, ref2_f32, atol=2e-2, rtol=2e-2), \
        "mismatch (f32 ref, test3)"

    print("KERNEL_OK")
</pallas_src>

<mosaic_0001>
module attributes {stable_mosaic.version = 11 : i64} {
  func.func @_prenorm_linear_resident_kernel(%arg0: i32, %arg1: memref<16x32xf32, #tpu.memory_space<vmem>>, %arg2: memref<1x32xf32, #tpu.memory_space<vmem>>, %arg3: memref<1x32xf32, #tpu.memory_space<vmem>>, %arg4: memref<32x128xbf16, #tpu.memory_space<vmem>>, %arg5: memref<1x128xf32, #tpu.memory_space<vmem>>, %arg6: memref<16x128xf32, #tpu.memory_space<vmem>>) attributes {dimension_semantics = [#tpu.dimension_semantics<parallel>], iteration_bounds = array<i64: 1>, scalar_prefetch = 0 : i64, scratch_operands = 0 : i64, tpu.core_type = #tpu.core_type<tc>, window_params = [{transform_indices = @transform_0, window_bounds = array<i64: 16, 32>}, {pipeline_mode = #tpu.pipeline_mode<synchronous>, transform_indices = @transform_1, window_bounds = array<i64: 1, 32>}, {pipeline_mode = #tpu.pipeline_mode<synchronous>, transform_indices = @transform_2, window_bounds = array<i64: 1, 32>}, {pipeline_mode = #tpu.pipeline_mode<synchronous>, transform_indices = @transform_3, window_bounds = array<i64: 32, 128>}, {pipeline_mode = #tpu.pipeline_mode<synchronous>, transform_indices = @transform_4, window_bounds = array<i64: 1, 128>}, {transform_indices = @transform_5, window_bounds = array<i64: 16, 128>}]} {
    %c0 = arith.constant 0 : index
    %c0_0 = arith.constant 0 : index
    %0 = vector.load %arg1[%c0, %c0_0] : memref<16x32xf32, #tpu.memory_space<vmem>>, vector<16x32xf32>
    %cst = arith.constant dense<0.000000e+00> : vector<16xf32>
    %1 = vector.multi_reduction <add>, %0, %cst [1] : vector<16x32xf32> to vector<16xf32>
    %2 = vector.shape_cast %1 : vector<16xf32> to vector<16x1xf32>
    %3 = arith.mulf %0, %0 : vector<16x32xf32>
    %cst_1 = arith.constant dense<0.000000e+00> : vector<16xf32>
    %4 = vector.multi_reduction <add>, %3, %cst_1 [1] : vector<16x32xf32> to vector<16xf32>
    %5 = vector.shape_cast %4 : vector<16xf32> to vector<16x1xf32>
    %cst_2 = arith.constant 3.125000e-02 : f32
    %6 = vector.broadcast %cst_2 : f32 to vector<16x1xf32>
    %7 = arith.mulf %2, %6 : vector<16x1xf32>
    %cst_3 = arith.constant 3.125000e-02 : f32
    %8 = vector.broadcast %cst_3 : f32 to vector<16x1xf32>
    %9 = arith.mulf %5, %8 : vector<16x1xf32>
    %10 = arith.mulf %7, %7 : vector<16x1xf32>
    %11 = arith.subf %9, %10 : vector<16x1xf32>
    %cst_4 = arith.constant 0.000000e+00 : f32
    %12 = vector.broadcast %cst_4 : f32 to vector<16x1xf32>
    %13 = arith.maximumf %11, %12 : vector<16x1xf32>
    %14 = vector.broadcast %7 : vector<16x1xf32> to vector<16x32xf32>
    %15 = arith.subf %0, %14 : vector<16x32xf32>
    %cst_5 = arith.constant 9.99999974E-6 : f32
    %16 = vector.broadcast %cst_5 : f32 to vector<16x1xf32>
    %17 = arith.addf %13, %16 : vector<16x1xf32>
    %18 = math.rsqrt %17 : vector<16x1xf32>
    %19 = vector.broadcast %18 : vector<16x1xf32> to vector<16x32xf32>
    %20 = arith.mulf %15, %19 : vector<16x32xf32>
    %c0_6 = arith.constant 0 : index
    %c0_7 = arith.constant 0 : index
    %21 = vector.load %arg2[%c0_6, %c0_7] : memref<1x32xf32, #tpu.memory_space<vmem>>, vector<1x32xf32>
    %22 = vector.broadcast %21 : vector<1x32xf32> to vector<16x32xf32>
    %23 = arith.mulf %20, %22 : vector<16x32xf32>
    %c0_8 = arith.constant 0 : index
    %c0_9 = arith.constant 0 : index
    %24 = vector.load %arg3[%c0_8, %c0_9] : memref<1x32xf32, #tpu.memory_space<vmem>>, vector<1x32xf32>
    %25 = vector.broadcast %24 : vector<1x32xf32> to vector<16x32xf32>
    %26 = arith.addf %23, %25 : vector<16x32xf32>
    %27 = arith.truncf %26 : vector<16x32xf32> to vector<16x32xbf16>
    %c0_10 = arith.constant 0 : index
    %c0_11 = arith.constant 0 : index
    %28 = vector.load %arg4[%c0_10, %c0_11] : memref<32x128xbf16, #tpu.memory_space<vmem>>, vector<32x128xbf16>
    %cst_12 = arith.constant dense<0.000000e+00> : vector<16x128xf32>
    %29 = tpu.matmul %27, %28, %cst_12 {dimension_numbers = #tpu.dot_dimension_numbers<[1], [0], [0], [1], [0, 0, 1, 1], [], []>} : vector<16x32xbf16>, vector<32x128xbf16>, vector<16x128xf32> -> vector<16x128xf32>
    %c0_13 = arith.constant 0 : index
    %c0_14 = arith.constant 0 : index
    %30 = vector.load %arg5[%c0_13, %c0_14] : memref<1x128xf32, #tpu.memory_space<vmem>>, vector<1x128xf32>
    %31 = vector.broadcast %30 : vector<1x128xf32> to vector<16x128xf32>
    %32 = arith.addf %29, %31 : vector<16x128xf32>
    %c0_15 = arith.constant 0 : index
    %c0_16 = arith.constant 0 : index
    %33 = vector.load %arg6[%c0_15, %c0_16] : memref<16x128xf32, #tpu.memory_space<vmem>>, vector<16x128xf32>
    tpu.vector_store %arg6[%c0_15, %c0_16], %32 {strides = array<i32>} : memref<16x128xf32, #tpu.memory_space<vmem>>, vector<16x128xf32>,
    return
  }
  func.func @transform_0(%arg0: i32) -> (i32, i32) {
    %c0_i32 = arith.constant 0 : i32
    %c0_i32_0 = arith.constant 0 : i32
    return %arg0, %c0_i32 : i32, i32
  }
  func.func @transform_1(%arg0: i32) -> (i32, i32) {
    %c0_i32 = arith.constant 0 : i32
    %c0_i32_0 = arith.constant 0 : i32
    %c0_i32_1 = arith.constant 0 : i32
    return %c0_i32, %c0_i32_0 : i32, i32
  }
  func.func @transform_2(%arg0: i32) -> (i32, i32) {
    %c0_i32 = arith.constant 0 : i32
    %c0_i32_0 = arith.constant 0 : i32
    %c0_i32_1 = arith.constant 0 : i32
    return %c0_i32, %c0_i32_0 : i32, i32
  }
  func.func @transform_3(%arg0: i32) -> (i32, i32) {
    %c0_i32 = arith.constant 0 : i32
    %c0_i32_0 = arith.constant 0 : i32
    %c0_i32_1 = arith.constant 0 : i32
    return %c0_i32, %c0_i32_0 : i32, i32
  }
  func.func @transform_4(%arg0: i32) -> (i32, i32) {
    %c0_i32 = arith.constant 0 : i32
    %c0_i32_0 = arith.constant 0 : i32
    %c0_i32_1 = arith.constant 0 : i32
    return %c0_i32, %c0_i32_0 : i32, i32
  }
  func.func @transform_5(%arg0: i32) -> (i32, i32) {
    %c0_i32 = arith.constant 0 : i32
    %c0_i32_0 = arith.constant 0 : i32
    return %arg0, %c0_i32 : i32, i32
  }
}

</mosaic_0001>

<bundles_post_ra>
// kernel: prenorm_linear.1
= control target key start
LH: loop header
LB: loop body
LE: loop exit
PB: predicated region body
PF: predicated region fallthrough
CT: control target
= control target key end

     0   :  { %vm23_vm0 = vcmask 261120   ;;  %v173_v8 = vmov 0.0   ;;  %vm174_vm1 = vmmov 0   ;;  %s237_s0 = inlined_call_operand.vmem [shape: f32[16,32], index: 0, kind: input, shape index: {}]   ;;  %s238_s3 = inlined_call_operand.vmem [shape: bf16[32,128], index: 3, kind: input, shape index: {}]   ;;  %s239_s1 = inlined_call_operand.vmem [shape: f32[1,32], index: 1, kind: input, shape index: {}]   ;;  %s240_s2 = inlined_call_operand.vmem [shape: f32[1,32], index: 2, kind: input, shape index: {}]   ;;  %s241_s4 = inlined_call_operand.vmem [shape: f32[1,128], index: 4, kind: input, shape index: {}]   ;;  %s242_s5 = inlined_call_operand.vmem [shape: f32[16,128], index: 5, kind: output, shape index: {}]  }
   0x1   :  { %v21_v0 = vld [vmem:[%s237_s0] sm:$0xff]  ;;  %v22_v1 = vld [vmem:[%s237_s0 + $0x8] sm:$0xff]  ;;  %157 = vmatprep.subr.bf16.mxu0 %v173_v8  ;;  %161 = vmatprep.mubr.msk.bf16.mxu0 %vm174_vm1, %v173_v8 }
   0x2   :  { %v24_v2 = vsel %vm23_vm0, %v21_v0, 0.0  ;;  %v30_v3 = vmul.f32 %v21_v0, %v21_v0  ;;  %v31_v4 = vmul.f32 %v22_v1, %v22_v1  ;;  %v27_v6 = vsel %vm23_vm0, %v22_v1, 0.0  ;;  %v167_v9 = vld [vmem:[%s238_s3] sm:$0xff]   ;;  %v168_v10 = vld [vmem:[%s238_s3 + $0x8] sm:$0xff]  }
   0x3   :  { %25 = vadd.xlane.f32.xlu0 %v24_v2  ;;  %158 = vmatpush3.bf16.msra.mxu0 %v167_v9  ;;  %v148_v30 = vld [vmem:[%s239_s1] ss:$0 sm:$0xff] }
   0x4   :  { %v32_v5 = vsel %vm23_vm0, %v30_v3, 0.0  ;;  %v35_v7 = vsel %vm23_vm0, %v31_v4, 0.0  ;;  %159 = vmatprep.subr.bf16.mxu0 %v173_v8  ;;  %v149_v35 = vld [vmem:[%s240_s2] ss:$0 sm:$0xff] }
   0x5   :  { %33 = vadd.xlane.f32.xlu1 %v32_v5  ;;  %v150_v40 = vld [vmem:[%s241_s4] ss:$0 sm:$0xff] }
   0x7   :  { %28 = vadd.xlane.f32.xlu0 %v27_v6  ;;  %160 = vmatpush3.bf16.msra.mxu0 %v168_v10 }
   0x9   :  { %36 = vadd.xlane.f32.xlu1 %v35_v7 }
  0x90   :  { %v26_v11 = vpop.xlane.xlu0 %25 }
  0x91   :  { %v38_v12 = vmul.f32 0.03125, %v26_v11 }
  0x92   :  { %v34_v13 = vpop.xlane.xlu1 %33 }
  0x93   :  { %v42_v14 = vmul.f32 %v38_v12, %v38_v12  ;;  %v40_v15 = vmul.f32 0.03125, %v34_v13  ;;  %v48_v27 = vsub.f32 %v21_v0, %v38_v12 }
  0x94   :  { %v29_v16 = vpop.xlane.xlu0 %28 }
  0x95   :  { %v44_v17 = vsub.f32 %v40_v15, %v42_v14  ;;  %v39_v18 = vmul.f32 0.03125, %v29_v16 }
  0x96   :  { %v37_v19 = vpop.xlane.xlu1 %36 }
  0x97   :  { %v46_v20 = vmax.f32 %v44_v17, 0.0  ;;  %v43_v21 = vmul.f32 %v39_v18, %v39_v18  ;;  %v41_v22 = vmul.f32 0.03125, %v37_v19  ;;  %v49_v31 = vsub.f32 %v22_v1, %v39_v18 }
  0x99   :  { %v50_v23 = vadd.f32 1e-05, %v46_v20  ;;  %v45_v24 = vsub.f32 %v41_v22, %v43_v21 }
  0x9b   :  { %169 = vrsqrt.f32 %v50_v23  ;;  %v47_v25 = vmax.f32 %v45_v24, 0.0 }
  0x9d   :  { %v51_v26 = vadd.f32 1e-05, %v47_v25 }
  0x9f   :  { %171 = vrsqrt.f32 %v51_v26 }
  0xa5   :  { %v170_v28 = vpop.eup %169 }
  0xa6   :  { %v54_v29 = vmul.f32 %v170_v28, %v48_v27 }
  0xa8   :  { %v63_v34 = vmul.f32 %v148_v30, %v54_v29 }
  0xa9   :  { %v172_v32 = vpop.eup %171 }
  0xaa   :  { %v55_v33 = vmul.f32 %v172_v32, %v49_v31  ;;  %v72_v37 = vadd.f32 %v149_v35, %v63_v34 }
  0xac   :  { %v64_v36 = vmul.f32 %v148_v30, %v55_v33 }
  0xae   :  { %v73_v38 = vadd.f32 %v149_v35, %v64_v36 }
  0xb0   :  { %v74_v39 = vpack.c.bf16 %v73_v38, %v72_v37 }
  0xb2   :  { %162 = vmatmul.mubr.msk.bf16.vlgmr.msra.gmra.mrb[0].mxu0 %vm23_vm0, %v74_v39 }
 0x185   :  { %v135_v41 = vpop.f32.mrb[0].mxu0 }
 0x186   :  { %v136_v42 = vadd.f32 %v150_v40, %v135_v41  ;;  %v163_v43 = vpop.f32.mrb[1].mxu0 }
 0x187   :  { %v138_v44 = vpop.f32.mrb[2].mxu0 }
 0x188   :  { %142 = vst [vmem:[%s242_s5] sm:$0xff] %v136_v42  ;;  %v139_v45 = vadd.f32 %v150_v40, %v138_v44  ;;  %v164_v46 = vpop.f32.mrb[3].mxu0 }
 0x18a   :  { %143 = vst [vmem:[%s242_s5 + $0x8] sm:$0xff] %v139_v45 }

</bundles_post_ra>
